<compile_context>
chip_gen: v7x
topology: tpu7x:2x2x1
jax: 0.10.0
libtpu: 0.0.40
codegen_flags: <defaults>
</compile_context>

<pallas_src>
import jax
import jax.numpy as jnp
from jax.experimental import pallas as pl
from jax.experimental.pallas import tpu as pltpu

IN_F = 8
OUT_F = 4
N = 1


def _linear_sub_kernel(x_ref, p_ref, o_ref):
    # x_ref: (8, 1) f32  -- x along sublanes (column vector)
    # p_ref: (16, 4) f32 -- rows 0:8  = W.T            (8, 4)
    #                       rows 8:12 = C = bias-other (4, 4)  (tile-aligned)
    x_col = x_ref[...]                          # (8, 1)
    w_t = p_ref[0:IN_F, :]                      # (8, 4)  free sublane-tile view
    c = p_ref[IN_F:IN_F + OUT_F, :]             # (4, 4)  starts on sublane 8

    # VPU/XLU path (no MXU): lane-broadcast x, elementwise multiply,
    # cross-sublane reduce -> (1, 4) row = x @ W.T
    row = jnp.sum(x_col * w_t, axis=0, keepdims=True)   # (1, 4)

    # Sublane-broadcast add: (1, 4) + (4, 4) -> (4, 4)
    o_ref[...] = row + c


def pack_params(weight, bias, other):
    """One-time parameter packing (off the per-call path).

    weight: (4, 8), bias: (1, 4), other: (4, 1) -> packed (16, 4) f32:
      rows 0:8   = W.T
      rows 8:12  = C,  C[i, j] = bias[0, j] - other[i, 0]
      rows 12:16 = zero padding (keeps both slices sublane-tile aligned)
    """
    w_t = weight.T.astype(jnp.float32)                   # (8, 4)
    c = (bias - other).astype(jnp.float32)               # (4, 4)
    packed = jnp.zeros((2 * IN_F, OUT_F), jnp.float32)   # (16, 4)
    packed = packed.at[:IN_F, :].set(w_t)
    packed = packed.at[IN_F:IN_F + OUT_F, :].set(c)
    return packed


def model_forward(x, packed_params):
    """x: (1, 8) f32, packed_params: (16, 4) f32 -> (4, 4) f32."""
    # (1, 8) is contiguous, so this reshape to a column is a free bitcast and
    # feeds the kernel's sublane axis directly (no in-kernel transpose).
    x_col = x.reshape(IN_F, 1)
    return pl.pallas_call(
        _linear_sub_kernel,
        out_shape=jax.ShapeDtypeStruct((OUT_F, OUT_F), jnp.float32),
        in_specs=[
            pl.BlockSpec(memory_space=pltpu.MemorySpace.VMEM),
            pl.BlockSpec(memory_space=pltpu.MemorySpace.VMEM),
        ],
        out_specs=pl.BlockSpec(memory_space=pltpu.MemorySpace.VMEM),
        # True tiny cost so XLA's scheduler does not serialize around the
        # opaque custom call in larger graphs.
        cost_estimate=pl.CostEstimate(flops=80, transcendentals=0,
                                      bytes_accessed=352),
    )(x_col, packed_params)


if __name__ == "__main__":
    key = jax.random.PRNGKey(0)
    kx, kw, kb = jax.random.split(key, 3)

    # Deterministic inputs / "parameters" (shapes from nn.Linear(8, 4)).
    x1 = jax.random.normal(kx, (N, IN_F), dtype=jnp.float32)
    bound = 1.0 / jnp.sqrt(IN_F)
    weight = jax.random.uniform(
        kw, (OUT_F, IN_F), dtype=jnp.float32, minval=-bound, maxval=bound
    )
    bias = jax.random.uniform(
        kb, (N, OUT_F), dtype=jnp.float32, minval=-bound, maxval=bound
    )
    # self.other = tensor([[81, -58, 49, -60]]).t() -> (4, 1); int64 promotes
    # to float32 in the PyTorch subtract, so use f32 directly.
    other = jnp.array([[81.0], [-58.0], [49.0], [-60.0]], dtype=jnp.float32)

    params = pack_params(weight, bias, other)  # one-time setup, not per-call

    fwd = jax.jit(model_forward)
    out = fwd(x1, params)
    jax.block_until_ready(out)

    # Pure-JAX reference (original semantics: (x @ W.T + bias) - other).
    ref = (x1 @ weight.T + bias) - other
    assert out.shape == (OUT_F, OUT_F)
    assert jnp.allclose(out, ref, atol=1e-5), "mismatch vs reference"
    print("KERNEL_OK")
</pallas_src>

<mosaic_0001>
module attributes {stable_mosaic.version = 11 : i64} {
  func.func @_linear_sub_kernel(%arg0: memref<8x1xf32, #tpu.memory_space<vmem>>, %arg1: memref<16x4xf32, #tpu.memory_space<vmem>>, %arg2: memref<4x4xf32, #tpu.memory_space<vmem>>) attributes {dimension_semantics = [], scalar_prefetch = 0 : i64, scratch_operands = 0 : i64, tpu.core_type = #tpu.core_type<tc>} {
    %c0 = arith.constant 0 : index
    %c0_0 = arith.constant 0 : index
    %0 = vector.load %arg0[%c0, %c0_0] : memref<8x1xf32, #tpu.memory_space<vmem>>, vector<8x1xf32>
    %c0_1 = arith.constant 0 : index
    %c0_2 = arith.constant 0 : index
    %1 = vector.load %arg1[%c0_1, %c0_2] : memref<16x4xf32, #tpu.memory_space<vmem>>, vector<8x4xf32>
    %c8 = arith.constant 8 : index
    %c0_3 = arith.constant 0 : index
    %2 = vector.load %arg1[%c8, %c0_3] : memref<16x4xf32, #tpu.memory_space<vmem>>, vector<4x4xf32>
    %3 = vector.broadcast %0 : vector<8x1xf32> to vector<8x4xf32>
    %4 = arith.mulf %3, %1 : vector<8x4xf32>
    %cst = arith.constant dense<0.000000e+00> : vector<4xf32>
    %5 = vector.multi_reduction <add>, %4, %cst [0] : vector<8x4xf32> to vector<4xf32>
    %6 = vector.shape_cast %5 : vector<4xf32> to vector<1x4xf32>
    %7 = vector.broadcast %6 : vector<1x4xf32> to vector<4x4xf32>
    %8 = arith.addf %7, %2 : vector<4x4xf32>
    %c0_4 = arith.constant 0 : index
    %c0_5 = arith.constant 0 : index
    %9 = vector.load %arg2[%c0_4, %c0_5] : memref<4x4xf32, #tpu.memory_space<vmem>>, vector<4x4xf32>
    tpu.vector_store %arg2[%c0_4, %c0_5], %8 {strides = array<i32>} : memref<4x4xf32, #tpu.memory_space<vmem>>, vector<4x4xf32>,
    return
  }
}

</mosaic_0001>

<bundles_post_ra>
// kernel: model_forward.1
= control target key start
LH: loop header
LB: loop body
LE: loop exit
PB: predicated region body
PF: predicated region fallthrough
CT: control target
= control target key end

     0   :  { %s111_s0 = inlined_call_operand.vmem [shape: f32[8,1], index: 0, kind: input, shape index: {}]   ;;  %s112_s1 = inlined_call_operand.vmem [shape: f32[16,4], index: 1, kind: input, shape index: {}]   ;;  %s113_s2 = inlined_call_operand.hbm [shape: f32[4,4], index: 2, kind: output, shape index: {}]  }
   0x1   :  { %v12_v0 = vld [vmem:[%s111_s0] sm:$0xff] }
   0x2   :  { %7 = vsyncpa [#allocation3], 0  ;;  %v73_v1 = vmov 0   ;;  %v13_v2 = vld [vmem:[%s112_s1] sm:$0xff]  ;;  %vm21_vm0 = vcmask 31744   ;;  %s74_s0 = smov [#allocation2]  }
   0x3   :  { %48 = vset.pattern.permute.xlu0 %v73_v1  ;;  %v14_v11 = vld [vmem:[%s112_s1 + $0x8] sm:$0xf]  ;;  %s38_s15 = sshll.u32 %s74_s0, 4  ;;  %vm30_vm1 = vcmask 27648   ;;  %s39_s15 = int_to_ptr.vmem [resolvable:$true] %s38_s15 }
   0x4   :  { %17 = vperm.xlu0 %48, %v12_v0   ;;  %s49_s16 = scalar_lea.vmem %s39_s15, 64  ;;  %p54_p1 = scmp.lt.s32.totalorder %s39_s15, %s39_s15 }
   0x5   :  { %p50_p0 = scmp.ne.s32.totalorder %s39_s15, %s49_s16  ;;  %p55_p2 = scmp.lt.s32.totalorder %s49_s16, %s49_s16 }
   0x7   :  { %p56_p3 = por %p55_p2, %p54_p1 }
   0x9   :  { %p57_p4 = pnand %p56_p3, %p50_p0 }
  0x83   :  { %v18_v3 = vpop.permute.xlu0 %17 }
  0x84   :  { %v20_v4 = vmul.f32 %v18_v3, %v13_v2 }
  0x86   :  { %v22_v5 = vsel %vm21_vm0, %v20_v4, 0.0 }
  0x87   :  { %v23_v6 = vrot.slane %v22_v5, 4 }
  0x89   :  { %v24_v7 = vadd.f32 %v23_v6, %v22_v5 }
  0x8b   :  { %v25_v8 = vrot.slane %v24_v7, 2 }
  0x8d   :  { %v26_v9 = vadd.f32 %v25_v8, %v24_v7 }
  0x8f   :  { %v27_v10 = vrot.slane %v26_v9, 1 }
  0x91   :  { %v28_v12 = vadd.f32 %v27_v10, %v26_v9 }
  0x93   :  { %v29_v13 = vadd.f32 %v28_v12, %v14_v11 }
  0x95   :  { %31 = vst.msk [vmem:[#allocation2] sm:$0xf] %vm30_vm1, %v29_v13 }
  0x96   :  { %60 = shalt.err (!%p57_p4)
}
  0x97   :  { %s61_s19 = scalar_lea.hbm %s113_s2, 64 }
  0x98   :  { %p62_p5 = scmp.ne.s32.totalorder %s113_s2, %s61_s19  ;;  %p65_p6 = scmp.lt.u32.totalorder %s61_s19, %s113_s2 }
  0x9a   :  { %p67_p7 = pnand %p65_p6, %p62_p5 }
  0x9c   :  { %70 = shalt.err (!%p67_p7)
}
  0x9d   :  { %41 = dma.vmem_to_hbm [thread:$0]  %s39_s15, 64, %s113_s2, [#allocation3]  }
  0x9e   :  { %71 = dma.done.wait [#allocation3], 64  }
  0x9f   :  { %72 = vsyncadd [#allocation3], 4294967232 }
  0xa0   :  { %45 = vsyncpa [#allocation3], 1 }

</bundles_post_ra>
